<compile_context>
chip_gen: v7x
topology: tpu7x:2x2x1
jax: 0.10.0
libtpu: 0.0.40
codegen_flags: <defaults>
</compile_context>

<pallas_src>
import functools

import jax
import jax.numpy as jnp
from jax import lax
from jax.experimental import pallas as pl
from jax.experimental.pallas import tpu as pltpu


def _round_up(x, m):
    return (x + m - 1) // m * m


def _pick_tile(hw, n_batch):
    """Largest multiple-of-128 tile dividing HW, preferring a >=2-step grid."""
    cands = [tm for tm in (1024, 512, 256, 128) if hw % tm == 0]
    if not cands:
        return hw                      # full-extent block is always legal
    for tm in cands:
        if n_batch * (hw // tm) >= 2:  # keep both v7x TensorCores fed
            return tm
    return cands[-1]


def _pick_sub(tm):
    for ts in (256, 128):
        if tm % ts == 0:
            return ts
    return tm


def _head_kernel(xc_ref, slab_ref, w1_ref, shift_ref, w2_ref, b2_ref, o_ref,
                 *, width, tsub, n_sub):
    # xc_ref   : (1, TM)       int32  x-coordinate (p % W) of each output pixel
    # slab_ref : (CP, TMH)     input slab, channels on sublanes, flattened
    #                          spatial (with W+1 halo each side) on lanes
    # w1_ref   : (9, C2P, CP)  conv1 tap matrices, BN scale folded in
    # shift_ref: (C2P, 1)      folded conv1 bias + BN shift
    # w2_ref   : (CoutP, C2P)  1x1 conv weights
    # b2_ref   : (CoutP, 1)    conv2 bias
    # o_ref    : (CoutP, TM)   output tile (channel-major, spatial on lanes)
    c2p = shift_ref.shape[0]
    for j in range(n_sub):                        # static: pl.ds starts stay aligned
        base = j * tsub
        xc = xc_ref[:, pl.ds(base, tsub)]         # (1, tsub)
        not_left = xc != 0                        # pixels with x == 0
        not_right = xc != (width - 1)             # pixels with x == W-1

        acc = jnp.zeros((c2p, tsub), jnp.float32)
        for ky in range(3):
            for kx in range(3):
                start = base + ky * width + kx    # shifted lane-slice = conv tap
                tap = slab_ref[:, pl.ds(start, tsub)]      # (CP, tsub)
                if kx == 0:
                    tap = jnp.where(not_left, tap, jnp.zeros_like(tap))
                elif kx == 2:
                    tap = jnp.where(not_right, tap, jnp.zeros_like(tap))
                acc = acc + jnp.dot(w1_ref[ky * 3 + kx], tap,
                                    preferred_element_type=jnp.float32)

        # bias + BN + ReLU in one fused epilogue
        h = jnp.maximum(acc + shift_ref[...], 0.0)          # (C2P, tsub) f32
        out = jnp.dot(w2_ref[...], h.astype(w2_ref.dtype),
                      preferred_element_type=jnp.float32) + b2_ref[...]
        o_ref[:, pl.ds(base, tsub)] = out.astype(o_ref.dtype)


def head_layer_pallas(x_nchw, params, *, matmul_dtype=jnp.float32):
    """Pallas implementation of HeadLayer.forward.  x_nchw: (N, C, H, W)."""
    N, C, H, W = x_nchw.shape
    w1 = params["w1"]                 # (C2, C, 3, 3)  OIHW (PyTorch layout)
    b1 = params["b1"]                 # (C2,)
    gamma, beta = params["gamma"], params["beta"]
    mean, var = params["mean"], params["var"]
    w2 = params["w2"]                 # (Cout, C2)
    b2 = params["b2"]                 # (Cout,)
    C2, Cout = w1.shape[0], w2.shape[0]
    eps = 1e-5
    HW = H * W

    CP = _round_up(C, 8)
    C2P = _round_up(C2, 8)
    CoutP = _round_up(Cout, 8)

    # ---- fold eval-mode BN (+ conv1 bias) into the conv1 tap weights --------
    scale = gamma / jnp.sqrt(var + eps)                       # (C2,)
    w1_taps = jnp.transpose(w1, (2, 3, 0, 1)) * scale[None, None, :, None]
    w1_all = w1_taps.reshape(9, C2, C)
    w1_all = jnp.pad(w1_all, ((0, 0), (0, C2P - C2), (0, CP - C))
                     ).astype(matmul_dtype)                   # (9, C2P, CP)
    shift = b1 * scale + (beta - mean * scale)                # (C2,)
    shift_col = jnp.pad(shift, (0, C2P - C2)).astype(jnp.float32)[:, None]
    w2p = jnp.pad(w2, ((0, CoutP - Cout), (0, C2P - C2))).astype(matmul_dtype)
    b2_col = jnp.pad(b2, (0, CoutP - Cout)).astype(jnp.float32)[:, None]

    # ---- flattened-spatial input with a (W+1)-zero halo on each end ---------
    xflat = x_nchw.reshape(N, C, HW).astype(matmul_dtype)
    xpad = jnp.pad(xflat, ((0, 0), (0, CP - C), (W + 1, W + 1)))  # (N, CP, L)

    TM = _pick_tile(HW, N)
    nT = HW // TM
    TMH = TM + 2 * W + 2
    if nT == 1:
        slabs = xpad[:, None]                                 # no copy
    else:
        slabs = jnp.stack(
            [xpad[:, :, t * TM: t * TM + TMH] for t in range(nT)], axis=1)

    # x-coordinate of every output pixel (for left/right boundary masks)
    xcoord = (jnp.arange(HW, dtype=jnp.int32) % W)[None, :]   # (1, HW)

    TSUB = _pick_sub(TM)
    n_sub = TM // TSUB
    kernel = functools.partial(_head_kernel, width=W, tsub=TSUB, n_sub=n_sub)

    itemsize = jnp.dtype(matmul_dtype).itemsize
    flops = 2 * N * HW * (9 * CP * C2P + C2P * CoutP)
    bytes_accessed = (int(slabs.size) * itemsize + N * CoutP * HW * 4
                      + int(w1_all.size + w2p.size) * itemsize + HW * 4)

    out_pad = pl.pallas_call(
        kernel,
        out_shape=jax.ShapeDtypeStruct((N, CoutP, HW), jnp.float32),
        grid_spec=pltpu.PrefetchScalarGridSpec(
            num_scalar_prefetch=0,
            grid=(N, nT),
            in_specs=[
                pl.BlockSpec((1, TM), lambda n, t: (0, t)),
                pl.BlockSpec((None, None, CP, TMH), lambda n, t: (n, t, 0, 0)),
                pl.BlockSpec((9, C2P, CP), lambda n, t: (0, 0, 0)),
                pl.BlockSpec((C2P, 1), lambda n, t: (0, 0)),
                pl.BlockSpec((CoutP, C2P), lambda n, t: (0, 0)),
                pl.BlockSpec((CoutP, 1), lambda n, t: (0, 0)),
            ],
            out_specs=pl.BlockSpec((None, CoutP, TM), lambda n, t: (n, 0, t)),
        ),
        compiler_params=pltpu.CompilerParams(
            dimension_semantics=("parallel", "parallel")),
        cost_estimate=pl.CostEstimate(flops=flops, transcendentals=0,
                                      bytes_accessed=bytes_accessed),
    )(xcoord, slabs, w1_all, shift_col, w2p, b2_col)

    out = out_pad if CoutP == Cout else out_pad[:, :Cout, :]
    return out.reshape(N, Cout, H, W)                         # free reshape (NCHW)


def head_layer_ref(x_nchw, params):
    """Pure-JAX reference (same eval-mode BN semantics)."""
    eps = 1e-5
    x = x_nchw.astype(jnp.float32)
    y = lax.conv_general_dilated(
        x, params["w1"].astype(jnp.float32), (1, 1), "SAME",
        dimension_numbers=("NCHW", "OIHW", "NCHW"),
        precision=lax.Precision.HIGHEST)
    y = y + params["b1"][None, :, None, None]
    scale = params["gamma"] / jnp.sqrt(params["var"] + eps)
    y = (y - params["mean"][None, :, None, None]) * scale[None, :, None, None] \
        + params["beta"][None, :, None, None]
    y = jnp.maximum(y, 0.0)
    y = lax.conv_general_dilated(
        y, params["w2"][:, :, None, None].astype(jnp.float32), (1, 1), "SAME",
        dimension_numbers=("NCHW", "OIHW", "NCHW"),
        precision=lax.Precision.HIGHEST)
    return y + params["b2"][None, :, None, None]


def init_params(key, channels, anchor_nums, class_num):
    c2 = channels * 2
    cout = anchor_nums * (class_num + 4)
    ks = jax.random.split(key, 8)
    return {
        "w1": 0.1 * jax.random.normal(ks[0], (c2, channels, 3, 3), jnp.float32),
        "b1": 0.1 * jax.random.normal(ks[1], (c2,), jnp.float32),
        "gamma": 1.0 + 0.1 * jax.random.normal(ks[2], (c2,), jnp.float32),
        "beta": 0.1 * jax.random.normal(ks[3], (c2,), jnp.float32),
        "mean": 0.1 * jax.random.normal(ks[4], (c2,), jnp.float32),
        "var": jnp.abs(1.0 + 0.1 * jax.random.normal(ks[5], (c2,), jnp.float32)),
        "w2": 0.1 * jax.random.normal(ks[6], (cout, c2), jnp.float32),
        "b2": 0.1 * jax.random.normal(ks[7], (cout,), jnp.float32),
    }


if __name__ == "__main__":
    batch, channels, spatial = 2, 4, 16
    anchor_nums, class_num = 3, 4          # -> Cout = 3 * (4 + 4) = 24

    key = jax.random.PRNGKey(0)
    k_x, k_p = jax.random.split(key)
    x = jax.random.normal(k_x, (batch, channels, spatial, spatial), jnp.float32)
    params = init_params(k_p, channels, anchor_nums, class_num)

    out = jax.block_until_ready(head_layer_pallas(x, params))
    ref = jax.block_until_ready(head_layer_ref(x, params))

    assert out.shape == (batch, anchor_nums * (class_num + 4), spatial, spatial)
    err = float(jnp.max(jnp.abs(out - ref)))
    assert jnp.allclose(out, ref, atol=1e-4, rtol=1e-4), f"max err {err}"

    print("KERNEL_OK")
</pallas_src>

<mosaic_0001>
module attributes {stable_mosaic.version = 11 : i64} {
  func.func @_head_kernel(%arg0: i32, %arg1: i32, %arg2: memref<1x256xi32, #tpu.memory_space<vmem>>, %arg3: memref<1x1x8x290xf32, #tpu.memory_space<vmem>>, %arg4: memref<9x8x8xf32, #tpu.memory_space<vmem>>, %arg5: memref<8x1xf32, #tpu.memory_space<vmem>>, %arg6: memref<24x8xf32, #tpu.memory_space<vmem>>, %arg7: memref<24x1xf32, #tpu.memory_space<vmem>>, %arg8: memref<1x24x256xf32, #tpu.memory_space<vmem>>) attributes {dimension_semantics = [#tpu.dimension_semantics<parallel>, #tpu.dimension_semantics<parallel>], iteration_bounds = array<i64: 2, 1>, scalar_prefetch = 0 : i64, scratch_operands = 0 : i64, tpu.core_type = #tpu.core_type<tc>, window_params = [{transform_indices = @transform_0, window_bounds = array<i64: 1, 256>}, {transform_indices = @transform_1, window_bounds = array<i64: 1, 1, 8, 290>}, {pipeline_mode = #tpu.pipeline_mode<synchronous>, transform_indices = @transform_2, window_bounds = array<i64: 9, 8, 8>}, {pipeline_mode = #tpu.pipeline_mode<synchronous>, transform_indices = @transform_3, window_bounds = array<i64: 8, 1>}, {pipeline_mode = #tpu.pipeline_mode<synchronous>, transform_indices = @transform_4, window_bounds = array<i64: 24, 8>}, {pipeline_mode = #tpu.pipeline_mode<synchronous>, transform_indices = @transform_5, window_bounds = array<i64: 24, 1>}, {transform_indices = @transform_6, window_bounds = array<i64: 1, 24, 256>}]} {
    %c0 = arith.constant 0 : index
    %c0_0 = arith.constant 0 : index
    %0 = vector.load %arg2[%c0, %c0_0] : memref<1x256xi32, #tpu.memory_space<vmem>>, vector<1x256xi32>
    %c0_i32 = arith.constant 0 : i32
    %1 = vector.broadcast %c0_i32 : i32 to vector<1x256xi32>
    %2 = arith.cmpi ne, %0, %1 : vector<1x256xi32>
    %c15_i32 = arith.constant 15 : i32
    %3 = vector.broadcast %c15_i32 : i32 to vector<1x256xi32>
    %4 = arith.cmpi ne, %0, %3 : vector<1x256xi32>
    %cst = arith.constant 0.000000e+00 : f32
    %5 = vector.broadcast %cst : f32 to vector<8x256xf32>
    %c0_1 = arith.constant 0 : index
    %c0_2 = arith.constant 0 : index
    %c0_3 = arith.constant 0 : index
    %c0_4 = arith.constant 0 : index
    %6 = vector.load %arg3[%c0_1, %c0_2, %c0_3, %c0_4] : memref<1x1x8x290xf32, #tpu.memory_space<vmem>>, vector<1x1x8x256xf32>
    %7 = vector.shape_cast %6 : vector<1x1x8x256xf32> to vector<8x256xf32>
    %cst_5 = arith.constant 0.000000e+00 : f32
    %8 = vector.broadcast %cst_5 : f32 to vector<8x256xf32>
    %9 = vector.shape_cast %2 : vector<1x256xi1> to vector<1x256xi1>
    %10 = vector.broadcast %9 : vector<1x256xi1> to vector<8x256xi1>
    %11 = arith.select %10, %7, %8 : vector<8x256xi1>, vector<8x256xf32>
    %c0_6 = arith.constant 0 : index
    %c0_7 = arith.constant 0 : index
    %c0_8 = arith.constant 0 : index
    %12 = vector.load %arg4[%c0_6, %c0_7, %c0_8] : memref<9x8x8xf32, #tpu.memory_space<vmem>>, vector<1x8x8xf32>
    %13 = vector.shape_cast %12 : vector<1x8x8xf32> to vector<8x8xf32>
    %cst_9 = arith.constant dense<0.000000e+00> : vector<8x256xf32>
    %14 = tpu.matmul %13, %11, %cst_9 {dimension_numbers = #tpu.dot_dimension_numbers<[1], [0], [0], [1], [0, 0, 1, 1], [], []>} : vector<8x8xf32>, vector<8x256xf32>, vector<8x256xf32> -> vector<8x256xf32>
    %15 = arith.addf %5, %14 : vector<8x256xf32>
    %c0_10 = arith.constant 0 : index
    %c0_11 = arith.constant 0 : index
    %c0_12 = arith.constant 0 : index
    %c1 = arith.constant 1 : index
    %16 = vector.load %arg3[%c0_10, %c0_11, %c0_12, %c1] : memref<1x1x8x290xf32, #tpu.memory_space<vmem>>, vector<1x1x8x256xf32>
    %17 = vector.shape_cast %16 : vector<1x1x8x256xf32> to vector<8x256xf32>
    %c1_13 = arith.constant 1 : index
    %c0_14 = arith.constant 0 : index
    %c0_15 = arith.constant 0 : index
    %18 = vector.load %arg4[%c1_13, %c0_14, %c0_15] : memref<9x8x8xf32, #tpu.memory_space<vmem>>, vector<1x8x8xf32>
    %19 = vector.shape_cast %18 : vector<1x8x8xf32> to vector<8x8xf32>
    %cst_16 = arith.constant dense<0.000000e+00> : vector<8x256xf32>
    %20 = tpu.matmul %19, %17, %cst_16 {dimension_numbers = #tpu.dot_dimension_numbers<[1], [0], [0], [1], [0, 0, 1, 1], [], []>} : vector<8x8xf32>, vector<8x256xf32>, vector<8x256xf32> -> vector<8x256xf32>
    %21 = arith.addf %15, %20 : vector<8x256xf32>
    %c0_17 = arith.constant 0 : index
    %c0_18 = arith.constant 0 : index
    %c0_19 = arith.constant 0 : index
    %c2 = arith.constant 2 : index
    %22 = vector.load %arg3[%c0_17, %c0_18, %c0_19, %c2] : memref<1x1x8x290xf32, #tpu.memory_space<vmem>>, vector<1x1x8x256xf32>
    %23 = vector.shape_cast %22 : vector<1x1x8x256xf32> to vector<8x256xf32>
    %cst_20 = arith.constant 0.000000e+00 : f32
    %24 = vector.broadcast %cst_20 : f32 to vector<8x256xf32>
    %25 = vector.shape_cast %4 : vector<1x256xi1> to vector<1x256xi1>
    %26 = vector.broadcast %25 : vector<1x256xi1> to vector<8x256xi1>
    %27 = arith.select %26, %23, %24 : vector<8x256xi1>, vector<8x256xf32>
    %c2_21 = arith.constant 2 : index
    %c0_22 = arith.constant 0 : index
    %c0_23 = arith.constant 0 : index
    %28 = vector.load %arg4[%c2_21, %c0_22, %c0_23] : memref<9x8x8xf32, #tpu.memory_space<vmem>>, vector<1x8x8xf32>
    %29 = vector.shape_cast %28 : vector<1x8x8xf32> to vector<8x8xf32>
    %cst_24 = arith.constant dense<0.000000e+00> : vector<8x256xf32>
    %30 = tpu.matmul %29, %27, %cst_24 {dimension_numbers = #tpu.dot_dimension_numbers<[1], [0], [0], [1], [0, 0, 1, 1], [], []>} : vector<8x8xf32>, vector<8x256xf32>, vector<8x256xf32> -> vector<8x256xf32>
    %31 = arith.addf %21, %30 : vector<8x256xf32>
    %c0_25 = arith.constant 0 : index
    %c0_26 = arith.constant 0 : index
    %c0_27 = arith.constant 0 : index
    %c16 = arith.constant 16 : index
    %32 = vector.load %arg3[%c0_25, %c0_26, %c0_27, %c16] : memref<1x1x8x290xf32, #tpu.memory_space<vmem>>, vector<1x1x8x256xf32>
    %33 = vector.shape_cast %32 : vector<1x1x8x256xf32> to vector<8x256xf32>
    %cst_28 = arith.constant 0.000000e+00 : f32
    %34 = vector.broadcast %cst_28 : f32 to vector<8x256xf32>
    %35 = vector.shape_cast %2 : vector<1x256xi1> to vector<1x256xi1>
    %36 = vector.broadcast %35 : vector<1x256xi1> to vector<8x256xi1>
    %37 = arith.select %36, %33, %34 : vector<8x256xi1>, vector<8x256xf32>
    %c3 = arith.constant 3 : index
    %c0_29 = arith.constant 0 : index
    %c0_30 = arith.constant 0 : index
    %38 = vector.load %arg4[%c3, %c0_29, %c0_30] : memref<9x8x8xf32, #tpu.memory_space<vmem>>, vector<1x8x8xf32>
    %39 = vector.shape_cast %38 : vector<1x8x8xf32> to vector<8x8xf32>
    %cst_31 = arith.constant dense<0.000000e+00> : vector<8x256xf32>
    %40 = tpu.matmul %39, %37, %cst_31 {dimension_numbers = #tpu.dot_dimension_numbers<[1], [0], [0], [1], [0, 0, 1, 1], [], []>} : vector<8x8xf32>, vector<8x256xf32>, vector<8x256xf32> -> vector<8x256xf32>
    %41 = arith.addf %31, %40 : vector<8x256xf32>
    %c0_32 = arith.constant 0 : index
    %c0_33 = arith.constant 0 : index
    %c0_34 = arith.constant 0 : index
    %c17 = arith.constant 17 : index
    %42 = vector.load %arg3[%c0_32, %c0_33, %c0_34, %c17] : memref<1x1x8x290xf32, #tpu.memory_space<vmem>>, vector<1x1x8x256xf32>
    %43 = vector.shape_cast %42 : vector<1x1x8x256xf32> to vector<8x256xf32>
    %c4 = arith.constant 4 : index
    %c0_35 = arith.constant 0 : index
    %c0_36 = arith.constant 0 : index
    %44 = vector.load %arg4[%c4, %c0_35, %c0_36] : memref<9x8x8xf32, #tpu.memory_space<vmem>>, vector<1x8x8xf32>
    %45 = vector.shape_cast %44 : vector<1x8x8xf32> to vector<8x8xf32>
    %cst_37 = arith.constant dense<0.000000e+00> : vector<8x256xf32>
    %46 = tpu.matmul %45, %43, %cst_37 {dimension_numbers = #tpu.dot_dimension_numbers<[1], [0], [0], [1], [0, 0, 1, 1], [], []>} : vector<8x8xf32>, vector<8x256xf32>, vector<8x256xf32> -> vector<8x256xf32>
    %47 = arith.addf %41, %46 : vector<8x256xf32>
    %c0_38 = arith.constant 0 : index
    %c0_39 = arith.constant 0 : index
    %c0_40 = arith.constant 0 : index
    %c18 = arith.constant 18 : index
    %48 = vector.load %arg3[%c0_38, %c0_39, %c0_40, %c18] : memref<1x1x8x290xf32, #tpu.memory_space<vmem>>, vector<1x1x8x256xf32>
    %49 = vector.shape_cast %48 : vector<1x1x8x256xf32> to vector<8x256xf32>
    %cst_41 = arith.constant 0.000000e+00 : f32
    %50 = vector.broadcast %cst_41 : f32 to vector<8x256xf32>
    %51 = vector.shape_cast %4 : vector<1x256xi1> to vector<1x256xi1>
    %52 = vector.broadcast %51 : vector<1x256xi1> to vector<8x256xi1>
    %53 = arith.select %52, %49, %50 : vector<8x256xi1>, vector<8x256xf32>
    %c5 = arith.constant 5 : index
    %c0_42 = arith.constant 0 : index
    %c0_43 = arith.constant 0 : index
    %54 = vector.load %arg4[%c5, %c0_42, %c0_43] : memref<9x8x8xf32, #tpu.memory_space<vmem>>, vector<1x8x8xf32>
    %55 = vector.shape_cast %54 : vector<1x8x8xf32> to vector<8x8xf32>
    %cst_44 = arith.constant dense<0.000000e+00> : vector<8x256xf32>
    %56 = tpu.matmul %55, %53, %cst_44 {dimension_numbers = #tpu.dot_dimension_numbers<[1], [0], [0], [1], [0, 0, 1, 1], [], []>} : vector<8x8xf32>, vector<8x256xf32>, vector<8x256xf32> -> vector<8x256xf32>
    %57 = arith.addf %47, %56 : vector<8x256xf32>
    %c0_45 = arith.constant 0 : index
    %c0_46 = arith.constant 0 : index
    %c0_47 = arith.constant 0 : index
    %c32 = arith.constant 32 : index
    %58 = vector.load %arg3[%c0_45, %c0_46, %c0_47, %c32] : memref<1x1x8x290xf32, #tpu.memory_space<vmem>>, vector<1x1x8x256xf32>
    %59 = vector.shape_cast %58 : vector<1x1x8x256xf32> to vector<8x256xf32>
    %cst_48 = arith.constant 0.000000e+00 : f32
    %60 = vector.broadcast %cst_48 : f32 to vector<8x256xf32>
    %61 = vector.shape_cast %2 : vector<1x256xi1> to vector<1x256xi1>
    %62 = vector.broadcast %61 : vector<1x256xi1> to vector<8x256xi1>
    %63 = arith.select %62, %59, %60 : vector<8x256xi1>, vector<8x256xf32>
    %c6 = arith.constant 6 : index
    %c0_49 = arith.constant 0 : index
    %c0_50 = arith.constant 0 : index
    %64 = vector.load %arg4[%c6, %c0_49, %c0_50] : memref<9x8x8xf32, #tpu.memory_space<vmem>>, vector<1x8x8xf32>
    %65 = vector.shape_cast %64 : vector<1x8x8xf32> to vector<8x8xf32>
    %cst_51 = arith.constant dense<0.000000e+00> : vector<8x256xf32>
    %66 = tpu.matmul %65, %63, %cst_51 {dimension_numbers = #tpu.dot_dimension_numbers<[1], [0], [0], [1], [0, 0, 1, 1], [], []>} : vector<8x8xf32>, vector<8x256xf32>, vector<8x256xf32> -> vector<8x256xf32>
    %67 = arith.addf %57, %66 : vector<8x256xf32>
    %c0_52 = arith.constant 0 : index
    %c0_53 = arith.constant 0 : index
    %c0_54 = arith.constant 0 : index
    %c33 = arith.constant 33 : index
    %68 = vector.load %arg3[%c0_52, %c0_53, %c0_54, %c33] : memref<1x1x8x290xf32, #tpu.memory_space<vmem>>, vector<1x1x8x256xf32>
    %69 = vector.shape_cast %68 : vector<1x1x8x256xf32> to vector<8x256xf32>
    %c7 = arith.constant 7 : index
    %c0_55 = arith.constant 0 : index
    %c0_56 = arith.constant 0 : index
    %70 = vector.load %arg4[%c7, %c0_55, %c0_56] : memref<9x8x8xf32, #tpu.memory_space<vmem>>, vector<1x8x8xf32>
    %71 = vector.shape_cast %70 : vector<1x8x8xf32> to vector<8x8xf32>
    %cst_57 = arith.constant dense<0.000000e+00> : vector<8x256xf32>
    %72 = tpu.matmul %71, %69, %cst_57 {dimension_numbers = #tpu.dot_dimension_numbers<[1], [0], [0], [1], [0, 0, 1, 1], [], []>} : vector<8x8xf32>, vector<8x256xf32>, vector<8x256xf32> -> vector<8x256xf32>
    %73 = arith.addf %67, %72 : vector<8x256xf32>
    %c0_58 = arith.constant 0 : index
    %c0_59 = arith.constant 0 : index
    %c0_60 = arith.constant 0 : index
    %c34 = arith.constant 34 : index
    %74 = vector.load %arg3[%c0_58, %c0_59, %c0_60, %c34] : memref<1x1x8x290xf32, #tpu.memory_space<vmem>>, vector<1x1x8x256xf32>
    %75 = vector.shape_cast %74 : vector<1x1x8x256xf32> to vector<8x256xf32>
    %cst_61 = arith.constant 0.000000e+00 : f32
    %76 = vector.broadcast %cst_61 : f32 to vector<8x256xf32>
    %77 = vector.shape_cast %4 : vector<1x256xi1> to vector<1x256xi1>
    %78 = vector.broadcast %77 : vector<1x256xi1> to vector<8x256xi1>
    %79 = arith.select %78, %75, %76 : vector<8x256xi1>, vector<8x256xf32>
    %c8 = arith.constant 8 : index
    %c0_62 = arith.constant 0 : index
    %c0_63 = arith.constant 0 : index
    %80 = vector.load %arg4[%c8, %c0_62, %c0_63] : memref<9x8x8xf32, #tpu.memory_space<vmem>>, vector<1x8x8xf32>
    %81 = vector.shape_cast %80 : vector<1x8x8xf32> to vector<8x8xf32>
    %cst_64 = arith.constant dense<0.000000e+00> : vector<8x256xf32>
    %82 = tpu.matmul %81, %79, %cst_64 {dimension_numbers = #tpu.dot_dimension_numbers<[1], [0], [0], [1], [0, 0, 1, 1], [], []>} : vector<8x8xf32>, vector<8x256xf32>, vector<8x256xf32> -> vector<8x256xf32>
    %83 = arith.addf %73, %82 : vector<8x256xf32>
    %c0_65 = arith.constant 0 : index
    %c0_66 = arith.constant 0 : index
    %84 = vector.load %arg5[%c0_65, %c0_66] : memref<8x1xf32, #tpu.memory_space<vmem>>, vector<8x1xf32>
    %85 = vector.broadcast %84 : vector<8x1xf32> to vector<8x256xf32>
    %86 = arith.addf %83, %85 : vector<8x256xf32>
    %cst_67 = arith.constant 0.000000e+00 : f32
    %87 = vector.broadcast %cst_67 : f32 to vector<8x256xf32>
    %88 = arith.maximumf %86, %87 : vector<8x256xf32>
    %c0_68 = arith.constant 0 : index
    %c0_69 = arith.constant 0 : index
    %89 = vector.load %arg6[%c0_68, %c0_69] : memref<24x8xf32, #tpu.memory_space<vmem>>, vector<24x8xf32>
    %cst_70 = arith.constant dense<0.000000e+00> : vector<24x256xf32>
    %90 = tpu.matmul %89, %88, %cst_70 {dimension_numbers = #tpu.dot_dimension_numbers<[1], [0], [0], [1], [0, 0, 1, 1], [], []>} : vector<24x8xf32>, vector<8x256xf32>, vector<24x256xf32> -> vector<24x256xf32>
    %c0_71 = arith.constant 0 : index
    %c0_72 = arith.constant 0 : index
    %91 = vector.load %arg7[%c0_71, %c0_72] : memref<24x1xf32, #tpu.memory_space<vmem>>, vector<24x1xf32>
    %92 = vector.broadcast %91 : vector<24x1xf32> to vector<24x256xf32>
    %93 = arith.addf %90, %92 : vector<24x256xf32>
    %c0_73 = arith.constant 0 : index
    %c0_74 = arith.constant 0 : index
    %c0_75 = arith.constant 0 : index
    %94 = vector.load %arg8[%c0_73, %c0_74, %c0_75] : memref<1x24x256xf32, #tpu.memory_space<vmem>>, vector<1x24x256xf32>
    %95 = vector.shape_cast %94 : vector<1x24x256xf32> to vector<24x256xf32>
    %96 = vector.shape_cast %93 : vector<24x256xf32> to vector<1x24x256xf32>
    tpu.vector_store %arg8[%c0_73, %c0_74, %c0_75], %96 {strides = array<i32>} : memref<1x24x256xf32, #tpu.memory_space<vmem>>, vector<1x24x256xf32>,
    return
  }
  func.func @transform_0(%arg0: i32, %arg1: i32) -> (i32, i32) {
    %c0_i32 = arith.constant 0 : i32
    %c0_i32_0 = arith.constant 0 : i32
    return %c0_i32, %arg1 : i32, i32
  }
  func.func @transform_1(%arg0: i32, %arg1: i32) -> (i32, i32, i32, i32) {
    %c0_i32 = arith.constant 0 : i32
    %c0_i32_0 = arith.constant 0 : i32
    %c0_i32_1 = arith.constant 0 : i32
    return %arg0, %arg1, %c0_i32, %c0_i32_0 : i32, i32, i32, i32
  }
  func.func @transform_2(%arg0: i32, %arg1: i32) -> (i32, i32, i32) {
    %c0_i32 = arith.constant 0 : i32
    %c0_i32_0 = arith.constant 0 : i32
    %c0_i32_1 = arith.constant 0 : i32
    %c0_i32_2 = arith.constant 0 : i32
    return %c0_i32, %c0_i32_0, %c0_i32_1 : i32, i32, i32
  }
  func.func @transform_3(%arg0: i32, %arg1: i32) -> (i32, i32) {
    %c0_i32 = arith.constant 0 : i32
    %c0_i32_0 = arith.constant 0 : i32
    %c0_i32_1 = arith.constant 0 : i32
    return %c0_i32, %c0_i32_0 : i32, i32
  }
  func.func @transform_4(%arg0: i32, %arg1: i32) -> (i32, i32) {
    %c0_i32 = arith.constant 0 : i32
    %c0_i32_0 = arith.constant 0 : i32
    %c0_i32_1 = arith.constant 0 : i32
    return %c0_i32, %c0_i32_0 : i32, i32
  }
  func.func @transform_5(%arg0: i32, %arg1: i32) -> (i32, i32) {
    %c0_i32 = arith.constant 0 : i32
    %c0_i32_0 = arith.constant 0 : i32
    %c0_i32_1 = arith.constant 0 : i32
    return %c0_i32, %c0_i32_0 : i32, i32
  }
  func.func @transform_6(%arg0: i32, %arg1: i32) -> (i32, i32, i32) {
    %c0_i32 = arith.constant 0 : i32
    %c0_i32_0 = arith.constant 0 : i32
    return %arg0, %c0_i32, %arg1 : i32, i32, i32
  }
}

</mosaic_0001>

<bundles_post_ra>
// kernel: tpu_custom_call.1
= control target key start
LH: loop header
LB: loop body
LE: loop exit
PB: predicated region body
PF: predicated region fallthrough
CT: control target
= control target key end

     0   :  { %11 = vsyncpa [#allocation3], 0  ;;  %s1874_s0 = inlined_call_operand.vmem [shape: s32[1,256], index: 0, kind: input, shape index: {}]   ;;  %s1875_s1 = inlined_call_operand.vmem [shape: f32[2,1,8,290], index: 1, kind: input, shape index: {}]   ;;  %s1876_s2 = inlined_call_operand.vmem [shape: f32[9,8,8], index: 2, kind: input, shape index: {}]   ;;  %s1877_s3 = inlined_call_operand.vmem [shape: f32[8,1], index: 3, kind: input, shape index: {}]   ;;  %s1878_s4 = inlined_call_operand.vmem [shape: f32[24,8], index: 4, kind: input, shape index: {}]   ;;  %s1879_s5 = inlined_call_operand.vmem [shape: f32[24,1], index: 5, kind: input, shape index: {}]   ;;  %s1880_s6 = inlined_call_operand.hbm [shape: f32[2,24,256], index: 6, kind: output, shape index: {}]  }
   0x1   :  { %13 = vsyncpa [#allocation3 + $0x1], 0  ;;  %s1624_s21 = smov 0   ;;  %s1626_s22 = smov 0  }
   0x2   :  { %s1628_s23 = smov 0   ;;  %s1630_s24 = smov 0  }
   0x3   :  { %s1632_s25 = smov 0   ;;  %s1634_s26 = smov 0  }
   0x4 LB: > { %s1366_s27 = sadd.s32 4294967295, %s1574_s26   ;;  %s1367_s28 = sadd.s32 4294967294, %s1574_s26   ;;  %s1574_s26 = sphi %s1634_s26, %s19_s26   ;;  %s1570_s25 = sphi %s1632_s25, %s1887_s25   ;;  %s1566_s24 = sphi %s1630_s24, %s1886_s24   ;;  %s1562_s23 = sphi %s1628_s23, %s1885_s23   ;;  %s1558_s22 = sphi %s1626_s22, %s1884_s22   ;;  %s1554_s21 = sphi %s1624_s21, %s1883_s21  }
   0x5   : > { %s31_s29 = sadd.s32 1, %s1570_s25  ;;  %s178_s30 = sadd.s32 1, %s1562_s23 }
   0x6   : > { %p33_p0 = scmp.ge.s32.totalorder %s31_s29, 2  ;;  %p188_p1 = scmp.ne.s32.totalorder %s1562_s23, %s1558_s22 }
   0x7   : > { %p189_p2 = scmp.eq.s32.totalorder %s1366_s27, 1  ;;  %p194_p3 = scmp.ne.s32.totalorder %s1558_s22, %s1554_s21 }
   0x8   : > { %s1889_s29 = smov (%p33_p0, %s31_s29), 0  ;;  %p195_p5 = scmp.eq.s32.totalorder %s1367_s28, 1 }
   0x9   : > { %p1664_p4 = por %p189_p2, %p188_p1  ;;  %s173_s8 = ssub.s32 %s1570_s25, %s1889_s29 }
   0xa   : > { %p1371_p6 = scmp.ge.s32.totalorder %s1574_s26, 1  ;;  %p176_p7 = scmp.eq.s32.totalorder %s173_s8, 0 }
   0xb   : > { %p1671_p8 = por %p195_p5, %p194_p3  ;;  %p245_p9 = scmp.lt.s32.totalorder %s1574_s26, 3 }
   0xc   : > { %s1677_s10 = scalar_select %p176_p7, %s1562_s23, %s178_s30  }
   0xd   : > { %p246_p10 = pnand %p1371_p6, %p245_p9 }
   0xe   : > { %p288_p11 = scmp.lt.s32.totalorder (!%p246_p10), %s1566_s24, 1  ;;  %v1576_v0 = vmov (!%p246_p10), 0   ;;  %v1577_v1 = vmov (!%p246_p10), 0.0   ;;  %s1578_s16 = smov (!%p246_p10), 112   ;;  %v1127_v5 = vld [vmem:[%s1877_s3] sm:$0xff] (!%p246_p10)  ;;  %v1142_v6 = vld [vmem:[%s1879_s5 + $0x10] sm:$0xff] (!%p246_p10)  ;;  %v304_v7 = vlaneseq (!%p246_p10) }
   0xf   : > { %249 = sbr.rel (%p246_p10) target bundleno = 649 (0x289), region = 44  ;;  %1494 = vset.pattern.permute.xlu0 (!%p246_p10), %v1576_v0  ;;  %1495 = vset.pattern.permute.xlu1 (!%p246_p10), %v1576_v0  ;;  %s1579_s17 = smov (!%p246_p10), 111   ;;  %v298_v8 = vld [vmem:[%s1874_s0] sm:$0x3] (!%p246_p10)  ;;  %vm591_vm3 = vcmask (!%p246_p10), 916480   ;;  %vm334_vm5 = vcmask (!%p246_p10), 64512  }
  0x10   : > { %667 = vmatprep.mubr.f32.mxu0 (!%p246_p10), %v1577_v1  ;;  %402 = vmatprep.mubr.f32.mxu1 (!%p246_p10), %v1577_v1  ;;  %s1580_s18 = smov (!%p246_p10), 110   ;;  %s1581_s19 = smov (!%p246_p10), 127   ;;  %v305_v9 = vshrl.u32 (!%p246_p10), %v304_v7, 7  ;;  %vm299_vm0 = vcmp.ne.s32.totalorder (!%p246_p10), %v298_v8, 0  ;;  %vm300_vm1 = vcmp.ne.s32.totalorder (!%p246_p10), %v298_v8, 15  ;;  %v1382_v21 = vld [vmem:[%s1876_s2 + $0x18] sm:$0xff] (!%p246_p10) }
  0x11   : > { %s1582_s20 = smov (!%p246_p10), 96   ;;  %s1583_s27 = smov (!%p246_p10), 95   ;;  %v303_v11 = vsel (!%p246_p10), %vm299_vm0, 1, %v1576_v0  ;;  %v483_v19 = vsel (!%p246_p10), %vm300_vm1, 1, %v1576_v0  ;;  %vm684_vm6 = vcmask (!%p246_p10), 908288   ;;  %vm771_vm7 = vcmask (!%p246_p10), 900096  }
  0x12   : > { %s1584_s28 = smov (!%p246_p10), 126   ;;  %s1585_s30 = smov (!%p246_p10), 94   ;;  %v310_v10 = vsub.s32 (!%p246_p10), 1, %v305_v9  ;;  %v306_v12 = vsub.s32 (!%p246_p10), 0, %v305_v9  ;;  %v1386_v32 = vld [vmem:[%s1876_s2 + $0x20] sm:$0xff] (!%p246_p10)  ;;  %vm329_vm10 = vcmask (!%p246_p10), 1039360  }
  0x13   : > { %v1388_v39 = vld [vmem:[%s1876_s2 + $0x28] sm:$0xff] (!%p246_p10)  ;;  %vm862_vm11 = vcmask (!%p246_p10), 785408   ;;  %v1392_v48 = vld [vmem:[%s1876_s2 + $0x30] sm:$0xff] (!%p246_p10)  ;;  %vm955_vm12 = vcmask (!%p246_p10), 777216   ;;  %v316_v51 = vld [vmem:[%s1876_s2] sm:$0xff] (!%p246_p10)  ;;  %vm500_vm13 = vcmask (!%p246_p10), 1031168  }
  0x14   : > { %v311_v13 = vrot.slane (!%p246_p10), %v303_v11, %v310_v10  ;;  %v1718_v16 = vrot.slane (!%p246_p10), %v303_v11, %v306_v12  ;;  %v1728_v23 = vrot.slane (!%p246_p10), %v483_v19, %v310_v10  ;;  %v1732_v28 = vrot.slane (!%p246_p10), %v483_v19, %v306_v12  ;;  %v1373_v42 = vld [vmem:[%s1876_s2 + $0x8] sm:$0xff] (!%p246_p10)  ;;  %v1396_v57 = vld [vmem:[%s1876_s2 + $0x38] sm:$0xff] (!%p246_p10)  ;;  %v1378_v63 = vld [vmem:[%s1876_s2 + $0x10] sm:$0xff] (!%p246_p10) }
  0x15   : > { %vm1042_vm14 = vcmask (!%p246_p10), 769024   ;;  %v1139_v19 = vld [vmem:[%s1878_s4 + $0x10] sm:$0xff] (!%p246_p10) }
  0x16   : > { %s289_s11 = scalar_select %p288_p11, %s1566_s24, 1  ;;  %vm313_vm2 = vcmp.eq.s32.totalorder %v311_v13, 1  ;;  %vm312_vm4 = vcmp.eq.s32.totalorder %v1718_v16, 1  ;;  %vm493_vm8 = vcmp.eq.s32.totalorder %v1728_v23, 1  ;;  %vm492_vm9 = vcmp.eq.s32.totalorder %v1732_v28, 1 }
  0x18   : > { %s1425_s12 = smul.u32 24, %s289_s11  ;;  %s1586_s11 = smov [#allocation2]  }
  0x1a   : > { %s296_s15 = scalar_lea.vmem %s1875_s1, %s1425_s12  ;;  %s1500_s12 = sshll.u32 %s1586_s11, 4  ;;  %s1501_s12 = int_to_ptr.vmem [resolvable:$false] %s1500_s12 }
  0x1b   : > { %v1688_v2 = vld [vmem:[%s296_s15 + $0x8] sm:$0xff]  ;;  %v1690_v3 = vld [vmem:[%s296_s15] sm:$0xff]  ;;  %v317_v4 = vld [vmem:[%s296_s15 + $0x10] sm:$0xff]  ;;  %s1502_s13 = scalar_lea.vmem %s1501_s12, 1536 }
  0x1c   : > { %587 = vrot.lane.b32.xlu0 %v1688_v2, %s1578_s16  ;;  %585 = vrot.lane.b32.xlu1 %v1690_v3, %s1578_s16 }
  0x20   : > { %589 = vrot.lane.b32.xlu0 %v317_v4, %s1578_s16  ;;  %680 = vrot.lane.b32.xlu1 %v1688_v2, %s1579_s17  ;;  %s280_s16 = sand.u32 1, %s1558_s22  }
  0x24   : > { %682 = vrot.lane.b32.xlu0 %v317_v4, %s1579_s17  ;;  %678 = vrot.lane.b32.xlu1 %v1690_v3, %s1579_s17  ;;  %s1424_s17 = smul.u32 48, %s280_s16 }
  0x28   : > { %767 = vrot.lane.b32.xlu0 %v1688_v2, %s1580_s18  ;;  %769 = vrot.lane.b32.xlu1 %v317_v4, %s1580_s18 }
  0x2c   : > { %765 = vrot.lane.b32.xlu0 %v1690_v3, %s1580_s18  ;;  %325 = vrot.lane.b32.xlu1 %v1688_v2, %s1581_s19  ;;  %s282_s18 = scalar_lea.vmem [#allocation2], %s1424_s17 }
  0x30   : > { %327 = vrot.lane.b32.xlu0 %v317_v4, %s1581_s19  ;;  %858 = vrot.lane.b32.xlu1 %v1688_v2, %s1582_s20 }
  0x34   : > { %860 = vrot.lane.b32.xlu0 %v317_v4, %s1582_s20  ;;  %323 = vrot.lane.b32.xlu1 %v1690_v3, %s1581_s19  ;;  %s1426_s19 = smul.u32 768, %s1566_s24  ;;  %s1828_s24 = scalar_lea.sflag [#allocation3], %s280_s16 }
  0x38   : > { %856 = vrot.lane.b32.xlu0 %v1690_v3, %s1582_s20  ;;  %951 = vrot.lane.b32.xlu1 %v1688_v2, %s1583_s27  ;;  %s1272_s20 = sshll.u32 %s282_s18, 4  ;;  %s1821_s20 = int_to_ptr.vmem [resolvable:$true] %s1272_s20 }
  0x39   : > { %s1496_s8 = scalar_lea.vmem %s1821_s20, 768  ;;  %p1503_p1 = scmp.lt.s32.totalorder %s1821_s20, %s1501_s12 }
  0x3a   : > { %p1497_p12 = scmp.ne.s32.totalorder %s1821_s20, %s1496_s8  ;;  %p1504_p2 = scmp.lt.s32.totalorder %s1502_s13, %s1496_s8 }
  0x3c   : > { %953 = vrot.lane.b32.xlu0 %v317_v4, %s1583_s27  ;;  %949 = vrot.lane.b32.xlu1 %v1690_v3, %s1583_s27  ;;  %p1498_p13 = pnand %p1497_p12, %p1664_p4  ;;  %p1505_p3 = por %p1504_p2, %p1503_p1 }
  0x3e   : > { %p1499_p0 = pneg %p1498_p13 }
  0x40   : > { %496 = vrot.lane.b32.xlu0 %v1688_v2, %s1584_s28  ;;  %498 = vrot.lane.b32.xlu1 %v317_v4, %s1584_s28  ;;  %p1506_p5 = pnand %p1505_p3, %p1499_p0 }
  0x44   : > { %1038 = vrot.lane.b32.xlu0 %v1688_v2, %s1585_s30  ;;  %1040 = vrot.lane.b32.xlu1 %v317_v4, %s1585_s30  ;;  %v1140_v4 = vld [vmem:[%s1879_s5] sm:$0xff] }
  0x48   : > { %494 = vrot.lane.b32.xlu0 %v1690_v3, %s1584_s28  ;;  %1036 = vrot.lane.b32.xlu1 %v1690_v3, %s1585_s30  ;;  %s1826_s30 = scalar_lea.hbm %s1880_s6, %s1426_s19 }
  0x4c   : > { %1130 = vperm.xlu0 %1494, %v1127_v5   ;;  %1145 = vperm.xlu1 %1495, %v1140_v4   ;;  %v1141_v5 = vld [vmem:[%s1879_s5 + $0x8] sm:$0xff] }
  0x50   : > { %1155 = vperm.xlu0 %1494, %v1142_v6   ;;  %1150 = vperm.xlu1 %1495, %v1141_v5  }
  0x8e   : > { %v588_v14 = vpop.permute.xlu0 %587  ;;  %v586_v15 = vpop.permute.xlu1 %585 }
  0x8f   : > { %v592_v22 = vsel %vm591_vm3, %v586_v15, %v588_v14 }
  0x92   : > { %v590_v17 = vpop.permute.xlu0 %589  ;;  %v681_v18 = vpop.permute.xlu1 %680 }
  0x93   : > { %v593_v20 = vsel %vm591_vm3, %v588_v14, %v590_v17  ;;  %v1137_v17 = vld [vmem:[%s1878_s4] sm:$0xff] }
  0x94   : > { %1383 = vmatprep.subr.msk.mxu0 %vm313_vm2, %v593_v20 }
  0x95   : > { %1384 = vmatpush1.msk.msra.mxu0 %vm312_vm4, %v592_v22 }
  0x96   : > { %v683_v24 = vpop.permute.xlu0 %682  ;;  %1385 = vmatmul.mubr.msk.f32.vlgmr.msra.gmra.mrb[0].mxu0 %vm334_vm5, %v1382_v21  ;;  %v679_v25 = vpop.permute.xlu1 %678 }
  0x97   : > { %v685_v26 = vsel %vm684_vm6, %v679_v25, %v681_v18  ;;  %v686_v27 = vsel %vm684_vm6, %v681_v18, %v683_v24  ;;  %756 = vmatprep.mubr.f32.mxu0 %v1577_v1  ;;  %v1138_v18 = vld [vmem:[%s1878_s4 + $0x8] sm:$0xff] }
  0x98   : > { %692 = vmatprep.subr.mxu0 %v686_v27 }
  0x99   : > { %693 = vmatpush1.msra.mxu0 %v685_v26 }
  0x9a   : > { %v768_v29 = vpop.permute.xlu0 %767  ;;  %v770_v30 = vpop.permute.xlu1 %769 }
  0x9b   : > { %v773_v31 = vsel %vm771_vm7, %v768_v29, %v770_v30 }
  0x9c   : > { %1389 = vmatprep.subr.msk.mxu0 %vm493_vm8, %v773_v31 }
  0x9e   : > { %v766_v33 = vpop.permute.xlu0 %765  ;;  %1387 = vmatmul.mubr.msk.f32.vlgmr.msra.gmra.mrb[0].mxu0 %vm334_vm5, %v1386_v32  ;;  %v326_v34 = vpop.permute.xlu1 %325 }
  0x9f   : > { %v772_v35 = vsel %vm771_vm7, %v766_v33, %v768_v29  ;;  %847 = vmatprep.mubr.f32.mxu0 %v1577_v1 }
  0xa0   : > { %1390 = vmatpush1.msk.msra.mxu0 %vm492_vm9, %v772_v35 }
  0xa2   : > { %v328_v36 = vpop.permute.xlu0 %327  ;;  %v859_v37 = vpop.permute.xlu1 %858 }
  0xa3   : > { %v331_v38 = vsel %vm329_vm10, %v326_v34, %v328_v36 }
  0xa4   : > { %338 = vmatprep.subr.mxu1 %v331_v38 }
  0xa6   : > { %v861_v40 = vpop.permute.xlu0 %860  ;;  %1391 = vmatmul.mubr.msk.f32.vlgmr.msra.gmra.mrb[0].mxu0 %vm334_vm5, %v1388_v39  ;;  %v324_v41 = vpop.permute.xlu1 %323 }
  0xa7   : > { %v864_v43 = vsel %vm862_vm11, %v859_v37, %v861_v40  ;;  %v330_v44 = vsel %vm329_vm10, %v324_v41, %v326_v34  ;;  %938 = vmatprep.mubr.f32.mxu0 %v1577_v1 }
  0xa8   : > { %339 = vmatpush1.msra.mxu1 %v330_v44  ;;  %1393 = vmatprep.subr.msk.mxu0 %vm313_vm2, %v864_v43 }
  0xa9   : > { %1374 = vmatmul.mubr.msk.f32.vlgmr.msra.gmra.mrb[0].mxu1 %vm334_vm5, %v1373_v42  ;;  %1375 = vmatprep.subr.msk.mxu1 %vm313_vm2, %v1688_v2 }
  0xaa   : > { %v857_v45 = vpop.permute.xlu0 %856  ;;  %v952_v46 = vpop.permute.xlu1 %951  ;;  %1376 = vmatpush1.msk.msra.mxu1 %vm312_vm4, %v1690_v3  ;;  %476 = vmatprep.mubr.f32.mxu1 %v1577_v1  ;;  %v1398_v3 = vld [vmem:[%s1876_s2 + $0x40] sm:$0xff] }
  0xab   : > { %v863_v47 = vsel %vm862_vm11, %v857_v45, %v859_v37 }
  0xac   : > { %1394 = vmatpush1.msk.msra.mxu0 %vm312_vm4, %v863_v47 }
  0xae   : > { %v954_v49 = vpop.permute.xlu0 %953  ;;  %1395 = vmatmul.mubr.msk.f32.vlgmr.msra.gmra.mrb[0].mxu0 %vm334_vm5, %v1392_v48  ;;  %v950_v50 = vpop.permute.xlu1 %949 }
  0xaf   : > { %v956_v52 = vsel %vm955_vm12, %v950_v50, %v952_v46  ;;  %v957_v53 = vsel %vm955_vm12, %v952_v46, %v954_v49  ;;  %1027 = vmatprep.mubr.f32.mxu0 %v1577_v1 }
  0xb0   : > { %963 = vmatprep.subr.mxu0 %v957_v53 }
  0xb1   : > { %964 = vmatpush1.msra.mxu0 %v956_v52  ;;  %1377 = vmatmul.mubr.msk.f32.vlgmr.msra.gmra.mrb[0].mxu1 %vm334_vm5, %v316_v51 }
  0xb2   : > { %v497_v54 = vpop.permute.xlu0 %496  ;;  %v499_v55 = vpop.permute.xlu1 %498  ;;  %576 = vmatprep.mubr.f32.mxu1 %v1577_v1 }
  0xb3   : > { %v502_v56 = vsel %vm500_vm13, %v497_v54, %v499_v55 }
  0xb4   : > { %1379 = vmatprep.subr.msk.mxu1 %vm493_vm8, %v502_v56 }
  0xb6   : > { %v1039_v58 = vpop.permute.xlu0 %1038  ;;  %1397 = vmatmul.mubr.msk.f32.vlgmr.msra.gmra.mrb[0].mxu0 %vm334_vm5, %v1396_v57  ;;  %v1041_v59 = vpop.permute.xlu1 %1040 }
  0xb7   : > { %v1044_v60 = vsel %vm1042_vm14, %v1039_v58, %v1041_v59  ;;  %1118 = vmatprep.mubr.f32.mxu0 %v1577_v1 }
  0xb8   : > { %1399 = vmatprep.subr.msk.mxu0 %vm493_vm8, %v1044_v60 }
  0xba   : > { %v495_v61 = vpop.permute.xlu0 %494  ;;  %v1037_v62 = vpop.permute.xlu1 %1036 }
  0xbb   : > { %v501_v0 = vsel %vm500_vm13, %v495_v61, %v497_v54  ;;  %v1043_v2 = vsel %vm1042_vm14, %v1037_v62, %v1039_v58 }
  0xbc   : > { %1380 = vmatpush1.msk.msra.mxu1 %vm492_vm9, %v501_v0  ;;  %1400 = vmatpush1.msk.msra.mxu0 %vm492_vm9, %v1043_v2 }
  0xbd   : > { %1381 = vmatmul.mubr.msk.f32.vlgmr.msra.gmra.mrb[0].mxu1 %vm334_vm5, %v1378_v63 }
  0xbe   : > { %1401 = vmatmul.mubr.msk.f32.vlgmr.msra.gmra.mrb[0].mxu0 %vm334_vm5, %v1398_v3  ;;  %1231 = vmatprep.mubr.f32.mxu1 %v1577_v1 }
  0xcb   : > { %v1131_v12 = vpop.permute.xlu0 %1130  ;;  %v1146_v20 = vpop.permute.xlu1 %1145 }
  0xcf   : > { %v1151_v25 = vpop.permute.xlu1 %1150  ;;  %v1156_v29 = vpop.permute.xlu0 %1155 }
 0x190   : > { %v578_v6 = vpop.f32.mrb[0].mxu1 }
 0x191   : > { %v580_v7 = vpop.f32.mrb[1].mxu1  ;;  %v1120_v8 = vpop.f32.mrb[0].mxu0 }
 0x192   : > { %v1408_v9 = vadd.f32 %v1120_v8, %v578_v6  ;;  %v1122_v10 = vpop.f32.mrb[1].mxu0 }
 0x193   : > { %v1409_v11 = vadd.f32 %v1122_v10, %v580_v7 }
 0x194   : > { %v1133_v13 = vadd.f32 %v1408_v9, %v1131_v12 }
 0x195   : > { %v1134_v14 = vadd.f32 %v1409_v11, %v1131_v12 }
 0x196   : > { %v1135_v16 = vmax.f32 %v1133_v13, 0.0 }
 0x197   : > { %v1136_v15 = vmax.f32 %v1134_v14, 0.0 }
 0x199   : > { %1167 = vmatprep.subr.mxu1 %v1136_v15 }
 0x19a   : > { %1168 = vmatpush1.msra.mxu1 %v1135_v16 }
 0x19b   : > { %1402 = vmatmul.mubr.msk.f32.vlgmr.msra.gmra.mrb[2].mxu1 %vm334_vm5, %v1137_v17 }
 0x19c   : > { %1237 = vmatprep.mubr.f32.mxu1 %v1577_v1 }
 0x19f   : > { %1403 = vmatmul.mubr.msk.f32.gmra.mrb[4].mxu1 %vm334_vm5, %v1138_v18 }
 0x1a0   : > { %1243 = vmatprep.mubr.f32.mxu1 %v1577_v1 }
 0x1a3   : > { %1404 = vmatmul.mubr.msk.f32.gmra.mrb[6].mxu1 %vm334_vm5, %v1139_v19 }
 0x26e   : > { %v1233_v21 = vpop.f32.mrb[2].mxu1 }
 0x26f   : > { %v1235_v22 = vpop.f32.mrb[3].mxu1  ;;  %v1234_v23 = vadd.f32 %v1233_v21, %v1146_v20 }
 0x270   : > { %v1236_v24 = vadd.f32 %v1235_v22, %v1146_v20 }
 0x271   : > { %1250 = vst [vmem:[%s282_s18] sm:$0xff] %v1234_v23 }
 0x272   : > { %v1239_v26 = vpop.f32.mrb[4].mxu1  ;;  %1251 = vst [vmem:[%s282_s18 + $0x8] sm:$0xff] %v1236_v24 }
 0x273   : > { %v1241_v1 = vpop.f32.mrb[5].mxu1  ;;  %v1240_v27 = vadd.f32 %v1239_v26, %v1151_v25 }
 0x274   : > { %v1242_v28 = vadd.f32 %v1241_v1, %v1151_v25 }
 0x275   : > { %1252 = vst [vmem:[%s282_s18 + $0x10] sm:$0xff] %v1240_v27 }
 0x276   : > { %v1245_v30 = vpop.f32.mrb[6].mxu1  ;;  %1253 = vst [vmem:[%s282_s18 + $0x18] sm:$0xff] %v1242_v28 }
 0x277   : > { %v1246_v31 = vadd.f32 %v1245_v30, %v1156_v29  ;;  %v1247_v32 = vpop.f32.mrb[7].mxu1 }
 0x278   : > { %v1248_v33 = vadd.f32 %v1247_v32, %v1156_v29 }
 0x279   : > { %1254 = vst [vmem:[%s282_s18 + $0x20] sm:$0xff] %v1246_v31 }
 0x27a   : > { %1255 = vst [vmem:[%s282_s18 + $0x28] sm:$0xff] %v1248_v33 }
 0x27b   : > { %1509 = shalt.err (!%p1506_p5)
}
 0x27c   : > { %s1510_s14 = scalar_lea.hbm %s1826_s30, 768  ;;  %s1514_s17 = scalar_lea.hbm %s1880_s6, 1536 }
 0x27d   : > { %p1511_p6 = scmp.ne.s32.totalorder %s1826_s30, %s1510_s14  ;;  %p1515_p10 = scmp.lt.u32.totalorder %s1826_s30, %s1880_s6 }
 0x27e   : > { %p1516_p11 = scmp.lt.u32.totalorder %s1514_s17, %s1510_s14  ;;  %p1518_p13 = scmp.lt.u32.totalorder %s1510_s14, %s1826_s30 }
 0x27f   : > { %p1512_p7 = pnand %p1511_p6, %p1664_p4 }
 0x280   : > { %p1517_p12 = por %p1516_p11, %p1515_p10 }
 0x281   : > { %p1513_p9 = pneg %p1512_p7 }
 0x282   : > { %p1519_p0 = por %p1518_p13, %p1517_p12 }
 0x284   : > { %p1520_p1 = pnand %p1519_p0, %p1513_p9 }
 0x286   : > { %1523 = shalt.err (!%p1520_p1)
}
 0x287   : > { %s1587_s27 = smov 256   ;;  %s1588_s28 = smov 16  }
 0x288   : > { %1427 = dma.vmem_to_hbm [thread:$0]  (%p1664_p4), %s1821_s20, 768, %s1826_s30, %s1828_s24, %s1587_s27, %s1587_s27, %s1588_s28  }
 0x289 PF: > { %p1433_p2 = scmp.ge.s32.totalorder %s1574_s26, 2  ;;  %s1287_s8 = sand.u32 1, %s1554_s21  }
 0x28a   : > { %s1288_s11 = scalar_lea.sflag [#allocation3], %s1287_s8 }
 0x28b   : > { %p1430_p3 = pnand %p1433_p2, %p1671_p8 }
 0x28d   : > { %1549 = dma.done.wait (!%p1430_p3), %s1288_s11, 768  }
 0x28e   : > { %1551 = vsyncadd (!%p1430_p3), %s1288_s11, 4294966528  ;;  %s19_s26 = sadd.s32 1, %s1574_s26   ;;  %s1883_s21 = smov %s1558_s22 }
 0x28f   : > { %p16_p5 = scmp.ge.s32.totalorder %s19_s26, 4   ;;  %s1884_s22 = smov %s1562_s23 }
 0x290   : > { %s1885_s23 = smov %s1677_s10  ;;  %s1886_s24 = smov %s1570_s25 }
 0x291   : > { %s1887_s25 = smov %s1889_s29  ;;  %18 = sbr.rel (!%p16_p5) target bundleno = 4 (0x4), region = 90 }
 0x298   :  { %1293 = vsyncpa [#allocation3], 1 }
 0x299   :  { %1295 = vsyncpa [#allocation3 + $0x1], 1 }

</bundles_post_ra>
